<compile_context>
chip_gen: v5e
topology: v5e:2x2
jax: 0.10.0
libtpu: 0.0.40
codegen_flags: <defaults>
</compile_context>

<pallas_src>
import functools
import math

import jax
import jax.numpy as jnp
from jax.experimental import pallas as pl
from jax.experimental.pallas import tpu as pltpu

_EPS = 1e-12  # F.normalize default eps


def _rms_normalize(t, g):
    # F.normalize(t, dim=-1) * g   (the sqrt(dim) factor is pre-folded into g).
    # Clamping the sum-of-squares at _EPS**2 is mathematically equivalent to
    # clamping the norm at _EPS (the PyTorch reference); it only matters for
    # pathological all-zero rows.
    ssq = jnp.sum(t * t, axis=-1, keepdims=True)
    return t * jax.lax.rsqrt(jnp.maximum(ssq, _EPS * _EPS)) * g


# --------------------------------------------------------------------------
# Pass 1: fused QKV projection + RMSNorm, output head-major (B, nh, L, dh).
# --------------------------------------------------------------------------
def _qkv_projection_kernel(x_ref,
                           w_q_ref, w_k_ref, w_v_ref,
                           b_q_ref, b_k_ref, b_v_ref,
                           g_q_ref, g_k_ref,
                           q_out_ref, k_out_ref, v_out_ref,
                           *, num_head, dim_head, mxu_dtype):
    nh, d = num_head, dim_head
    x = x_ref[0].astype(mxu_dtype)                                    # (TP, D)
    tp = x.shape[0]

    def project(w_ref, b_ref, g_ref=None):
        y = jnp.dot(x, w_ref[...],
                    preferred_element_type=jnp.float32) + b_ref[...]  # (TP, H)
        if g_ref is not None:
            y = _rms_normalize(y, g_ref[...])
        # One head-major relayout per token block (NOT per attention step).
        return jnp.swapaxes(y.reshape(tp, nh, d), 0, 1)               # (nh, TP, d)

    q_out_ref[0] = project(w_q_ref, b_q_ref, g_q_ref).astype(q_out_ref.dtype)
    k_out_ref[0] = project(w_k_ref, b_k_ref, g_k_ref).astype(k_out_ref.dtype)
    v_out_ref[0] = project(w_v_ref, b_v_ref).astype(v_out_ref.dtype)


# --------------------------------------------------------------------------
# Pass 2: flash attention (online softmax) + head merge + output projection.
# --------------------------------------------------------------------------
def _flash_attention_kernel(q_ref, k_ref, v_ref,
                            w_out_ref, b_out_ref, g_out_ref,
                            o_ref,
                            m_scr, l_scr, acc_scr,
                            *, mxu_dtype, exp_dtype, approx_recip):
    ki = pl.program_id(2)
    nk = pl.num_programs(2)

    @pl.when(ki == 0)
    def _init():
        m_scr[...] = jnp.full(m_scr.shape, -jnp.inf, dtype=m_scr.dtype)
        l_scr[...] = jnp.zeros_like(l_scr)
        acc_scr[...] = jnp.zeros_like(acc_scr)

    q = q_ref[0]                                                      # (nh, TQ, d)
    k = k_ref[0]                                                      # (nh, TK, d)
    v = v_ref[0]                                                      # (nh, TK, d)

    # log2(e) and dim_head**-0.5 are folded into the q gain, so `s` already
    # lives in the log2 domain and exp2 reproduces exp of the true logits.
    s = jnp.einsum('hqd,hkd->hqk', q, k,
                   preferred_element_type=jnp.float32)                # (nh, TQ, TK)

    m_prev = m_scr[...]                                               # (nh, TQ)
    m_new = jnp.maximum(m_prev, jnp.max(s, axis=-1))
    alpha = jnp.exp2((m_prev - m_new).astype(exp_dtype)).astype(jnp.float32)
    p = jnp.exp2((s - m_new[:, :, None]).astype(exp_dtype))           # (nh, TQ, TK)
    l_scr[...] = alpha * l_scr[...] + jnp.sum(p.astype(jnp.float32), axis=-1)
    acc_scr[...] = alpha[:, :, None] * acc_scr[...] + jnp.einsum(
        'hqk,hkd->hqd', p.astype(mxu_dtype), v,
        preferred_element_type=jnp.float32)
    m_scr[...] = m_new

    @pl.when(ki == nk - 1)
    def _finalize():
        inv_l = pl.reciprocal(l_scr[...], approx=approx_recip)        # (nh, TQ)
        out = acc_scr[...] * inv_l[:, :, None]                        # (nh, TQ, d)
        nh, tq, d = out.shape
        # channel order (h, dv) matches rearrange('b h dv l -> b l (h dv)')
        out_h = jnp.swapaxes(out, 0, 1).reshape(tq, nh * d)           # (TQ, H)
        y = jnp.dot(out_h.astype(mxu_dtype), w_out_ref[...],
                    preferred_element_type=jnp.float32) + b_out_ref[...]
        y = _rms_normalize(y, g_out_ref[...])                         # gain folds sqrt(D)
        o_ref[0] = y.astype(o_ref.dtype)


def _tpu_defaults():
    """Per-generation tile / VMEM / exponent-dtype defaults."""
    kind = ""
    try:
        kind = jax.devices()[0].device_kind.lower()
    except Exception:
        pass
    if "v7" in kind:
        # 256-wide MXU, bf16 EUP, but only 64 MiB VMEM per TensorCore.
        return dict(q_block=256, k_block=256, vmem_bytes=56 * 1024 * 1024,
                    bf16_exp=True)
    if "v6" in kind:
        # 256-wide MXU, 128 MiB VMEM, bf16 EUP.
        return dict(q_block=256, k_block=512, vmem_bytes=96 * 1024 * 1024,
                    bf16_exp=True)
    if "v5" in kind and ("lite" in kind or "v5e" in kind):
        # 128-wide MXU, lowest HBM BW, no bf16 VPU/EUP.
        return dict(q_block=128, k_block=512, vmem_bytes=100 * 1024 * 1024,
                    bf16_exp=False)
    # Unknown / older generation: conservative.
    return dict(q_block=128, k_block=256, vmem_bytes=48 * 1024 * 1024,
                bf16_exp=False)


def self_attention(x, w_qkv, b_qkv, g_q, g_k, w_out, b_out, g_out, *,
                   num_head, dim_head, q_block=None, k_block=None,
                   mxu_dtype=jnp.bfloat16):
    B, L, D = x.shape
    H = num_head * dim_head
    assert w_qkv.shape == (D, 3 * H)
    assert w_out.shape == (H, D)

    cfg = _tpu_defaults()
    q_block = cfg["q_block"] if q_block is None else q_block
    k_block = cfg["k_block"] if k_block is None else k_block

    f32 = jnp.float32
    exact = (mxu_dtype == jnp.float32)
    # bf16 exponent only where the EUP supports bf16 and only on the bf16
    # MXU path; the f32 path stays fully f32 for exactness checks.
    exp_dtype = jnp.bfloat16 if (cfg["bf16_exp"] and not exact) else jnp.float32
    approx_recip = not exact

    scale = dim_head ** (-0.5)
    log2e = 1.0 / math.log(2.0)

    # Split the QKV weight, cast MXU operands, and fold every constant
    # multiplier (sqrt(dim) of the RMSNorms, dim_head**-0.5, log2(e) for the
    # exp2 trick) into the gain vectors on the host.
    w_q = w_qkv[:, :H].astype(mxu_dtype)
    w_k = w_qkv[:, H:2 * H].astype(mxu_dtype)
    w_v = w_qkv[:, 2 * H:].astype(mxu_dtype)
    b_qkv2 = jnp.reshape(b_qkv, (1, 3 * H)).astype(f32)
    b_q, b_k, b_v = b_qkv2[:, :H], b_qkv2[:, H:2 * H], b_qkv2[:, 2 * H:]
    g_q_eff = jnp.reshape(g_q, (1, H)).astype(f32) * (math.sqrt(H) * scale * log2e)
    g_k_eff = jnp.reshape(g_k, (1, H)).astype(f32) * math.sqrt(H)
    g_out_eff = jnp.reshape(g_out, (1, D)).astype(f32) * math.sqrt(D)
    w_out_c = w_out.astype(mxu_dtype)
    b_out_c = jnp.reshape(b_out, (1, D)).astype(f32)

    # Cast x once on the host so the streamed tile of pass 1 is half the
    # bytes on the bf16 path (matters most on v5e's HBM bandwidth).
    x_in = x.astype(mxu_dtype)

    def resident_spec(arr, n_grid):
        nd = arr.ndim
        if n_grid == 2:
            index_map = lambda b, i, _nd=nd: (0,) * _nd
        else:
            index_map = lambda b, qi, ki, _nd=nd: (0,) * _nd
        # Constant index_map => DMA'd once and VMEM-resident for the whole
        # grid; single buffer (no point double-buffering constants).
        return pl.BlockSpec(arr.shape, index_map, pipeline_mode=pl.Buffered(1))

    # ---------------- pass 1: fused QKV projection + RMSNorm ----------------
    tp = min(q_block, L)
    assert L % tp == 0, "sequence length must tile evenly"

    qkv_shape = jax.ShapeDtypeStruct((B, num_head, L, dim_head), mxu_dtype)
    proj_kernel = functools.partial(
        _qkv_projection_kernel,
        num_head=num_head, dim_head=dim_head, mxu_dtype=mxu_dtype)

    hm_out_spec = pl.BlockSpec((1, num_head, tp, dim_head),
                               lambda b, i: (b, 0, i, 0))
    q_hm, k_hm, v_hm = pl.pallas_call(
        proj_kernel,
        out_shape=(qkv_shape, qkv_shape, qkv_shape),
        grid=(B, L // tp),
        in_specs=[
            pl.BlockSpec((1, tp, D), lambda b, i: (b, i, 0)),
            resident_spec(w_q, 2), resident_spec(w_k, 2), resident_spec(w_v, 2),
            resident_spec(b_q, 2), resident_spec(b_k, 2), resident_spec(b_v, 2),
            resident_spec(g_q_eff, 2), resident_spec(g_k_eff, 2),
        ],
        out_specs=(hm_out_spec, hm_out_spec, hm_out_spec),
        compiler_params=pltpu.CompilerParams(
            dimension_semantics=("parallel", "parallel"),
            vmem_limit_bytes=cfg["vmem_bytes"]),
    )(x_in, w_q, w_k, w_v, b_q, b_k, b_v, g_q_eff, g_k_eff)

    # -------- pass 2: flash attention + head merge + output projection ------
    tq = min(q_block, L)
    tk = min(k_block, L)
    assert L % tq == 0 and L % tk == 0, "sequence length must tile evenly"
    grid = (B, L // tq, L // tk)
    # Note (v7x): B * (L // tq) should be even so both TensorCores get
    # balanced work from the two "parallel" axes.

    attn_kernel = functools.partial(
        _flash_attention_kernel,
        mxu_dtype=mxu_dtype, exp_dtype=exp_dtype, approx_recip=approx_recip)

    return pl.pallas_call(
        attn_kernel,
        out_shape=jax.ShapeDtypeStruct((B, L, D), x.dtype),
        grid=grid,
        in_specs=[
            # Q is constant across ki => fetched once per query block.
            pl.BlockSpec((1, num_head, tq, dim_head),
                         lambda b, qi, ki: (b, 0, qi, 0)),
            # Streamed K/V tiles keep the default double buffering (their
            # DMA hides behind the two matmuls + softmax update).
            pl.BlockSpec((1, num_head, tk, dim_head),
                         lambda b, qi, ki: (b, 0, ki, 0)),
            pl.BlockSpec((1, num_head, tk, dim_head),
                         lambda b, qi, ki: (b, 0, ki, 0)),
            resident_spec(w_out_c, 3), resident_spec(b_out_c, 3),
            resident_spec(g_out_eff, 3),
        ],
        out_specs=pl.BlockSpec((1, tq, D), lambda b, qi, ki: (b, qi, 0)),
        scratch_shapes=[
            pltpu.VMEM((num_head, tq), jnp.float32),            # running max (lane-dense)
            pltpu.VMEM((num_head, tq), jnp.float32),            # running sum (lane-dense)
            pltpu.VMEM((num_head, tq, dim_head), jnp.float32),  # output accumulator
        ],
        compiler_params=pltpu.CompilerParams(
            dimension_semantics=("parallel", "parallel", "arbitrary"),
            vmem_limit_bytes=cfg["vmem_bytes"]),
    )(q_hm, k_hm, v_hm, w_out_c, b_out_c, g_out_eff)


def reference(x, w_qkv, b_qkv, g_q, g_k, w_out, b_out, g_out,
              *, num_head, dim_head):
    """Pure-JAX mirror of the PyTorch forward, for verification."""
    B, L, D = x.shape
    H = num_head * dim_head

    def rms_norm(t, g, dim):
        n = jnp.sqrt(jnp.sum(t * t, axis=-1, keepdims=True))
        return t / jnp.maximum(n, _EPS) * g * math.sqrt(dim)

    qkv = x @ w_qkv + jnp.reshape(b_qkv, (1, 1, 3 * H))
    q, k, v = jnp.split(qkv, 3, axis=-1)
    q = rms_norm(q, jnp.reshape(g_q, (1, 1, H)), H)
    k = rms_norm(k, jnp.reshape(g_k, (1, 1, H)), H)
    q = q * dim_head ** (-0.5)
    qh = q.reshape(B, L, num_head, dim_head).transpose(0, 2, 1, 3)
    kh = k.reshape(B, L, num_head, dim_head).transpose(0, 2, 1, 3)
    vh = v.reshape(B, L, num_head, dim_head).transpose(0, 2, 1, 3)
    sim = jnp.einsum('bhld,bhnd->bhln', qh, kh)
    attn = jax.nn.softmax(sim, axis=-1)
    out = jnp.einsum('bhln,bhnd->bhld', attn, vh)
    out = out.transpose(0, 2, 1, 3).reshape(B, L, H)
    y = out @ w_out + jnp.reshape(b_out, (1, 1, D))
    return rms_norm(y, jnp.reshape(g_out, (1, 1, D)), D)


if __name__ == "__main__":
    # Small deterministic problem: batch=2, seq=8, dim=32, 4 heads of size 8.
    B, L, D = 2, 8, 32
    num_head, dim_head = 4, 8
    H = num_head * dim_head

    key = jax.random.PRNGKey(0)
    kx, kwq, kbq, kwo, kbo = jax.random.split(key, 5)

    x = jax.random.normal(kx, (B, L, D), dtype=jnp.float32)
    # nn.Linear-style parameters (stored as (in, out) for x @ W).
    w_qkv = jax.random.normal(kwq, (D, 3 * H), dtype=jnp.float32) / math.sqrt(D)
    b_qkv = jax.random.normal(kbq, (3 * H,), dtype=jnp.float32) * 0.02
    w_out = jax.random.normal(kwo, (H, D), dtype=jnp.float32) / math.sqrt(H)
    b_out = jax.random.normal(kbo, (D,), dtype=jnp.float32) * 0.02
    # RMSNorm learnable gains initialise to ones in the module.
    g_q = jnp.ones((H,), jnp.float32)
    g_k = jnp.ones((H,), jnp.float32)
    g_out = jnp.ones((D,), jnp.float32)

    ref = reference(x, w_qkv, b_qkv, g_q, g_k, w_out, b_out, g_out,
                    num_head=num_head, dim_head=dim_head)

    # Production config (bf16 MXU operands + bf16 Q/K/V in HBM, bf16 exponent
    # where supported): loose tolerance vs. the f32 reference.
    out_bf16 = self_attention(x, w_qkv, b_qkv, g_q, g_k, w_out, b_out, g_out,
                              num_head=num_head, dim_head=dim_head,
                              mxu_dtype=jnp.bfloat16)
    out_bf16 = jax.block_until_ready(out_bf16)
    assert out_bf16.shape == (B, L, D)
    err_bf16 = float(jnp.max(jnp.abs(out_bf16 - ref)))
    assert jnp.allclose(out_bf16, ref, atol=1e-1, rtol=1e-1), \
        f"bf16-MXU path max abs err = {err_bf16}"

    # f32 MXU operands + f32 exponent + exact reciprocal: tight check.
    out_f32 = self_attention(x, w_qkv, b_qkv, g_q, g_k, w_out, b_out, g_out,
                             num_head=num_head, dim_head=dim_head,
                             mxu_dtype=jnp.float32)
    out_f32 = jax.block_until_ready(out_f32)
    err_f32 = float(jnp.max(jnp.abs(out_f32 - ref)))
    assert jnp.allclose(out_f32, ref, atol=1e-3, rtol=1e-3), \
        f"f32-MXU path max abs err = {err_f32}"

    print("KERNEL_OK")
</pallas_src>

<mosaic_0001>
module attributes {stable_mosaic.version = 11 : i64} {
  func.func @_qkv_projection_kernel(%arg0: i32, %arg1: i32, %arg2: memref<1x8x32xbf16, #tpu.memory_space<vmem>>, %arg3: memref<32x32xbf16, #tpu.memory_space<vmem>>, %arg4: memref<32x32xbf16, #tpu.memory_space<vmem>>, %arg5: memref<32x32xbf16, #tpu.memory_space<vmem>>, %arg6: memref<1x32xf32, #tpu.memory_space<vmem>>, %arg7: memref<1x32xf32, #tpu.memory_space<vmem>>, %arg8: memref<1x32xf32, #tpu.memory_space<vmem>>, %arg9: memref<1x32xf32, #tpu.memory_space<vmem>>, %arg10: memref<1x32xf32, #tpu.memory_space<vmem>>, %arg11: memref<1x4x8x8xbf16, #tpu.memory_space<vmem>>, %arg12: memref<1x4x8x8xbf16, #tpu.memory_space<vmem>>, %arg13: memref<1x4x8x8xbf16, #tpu.memory_space<vmem>>) attributes {dimension_semantics = [#tpu.dimension_semantics<parallel>, #tpu.dimension_semantics<parallel>], iteration_bounds = array<i64: 2, 1>, scalar_prefetch = 0 : i64, scratch_operands = 0 : i64, tpu.core_type = #tpu.core_type<tc>, window_params = [{transform_indices = @transform_0, window_bounds = array<i64: 1, 8, 32>}, {pipeline_mode = #tpu.pipeline_mode<synchronous>, transform_indices = @transform_1, window_bounds = array<i64: 32, 32>}, {pipeline_mode = #tpu.pipeline_mode<synchronous>, transform_indices = @transform_2, window_bounds = array<i64: 32, 32>}, {pipeline_mode = #tpu.pipeline_mode<synchronous>, transform_indices = @transform_3, window_bounds = array<i64: 32, 32>}, {pipeline_mode = #tpu.pipeline_mode<synchronous>, transform_indices = @transform_4, window_bounds = array<i64: 1, 32>}, {pipeline_mode = #tpu.pipeline_mode<synchronous>, transform_indices = @transform_5, window_bounds = array<i64: 1, 32>}, {pipeline_mode = #tpu.pipeline_mode<synchronous>, transform_indices = @transform_6, window_bounds = array<i64: 1, 32>}, {pipeline_mode = #tpu.pipeline_mode<synchronous>, transform_indices = @transform_7, window_bounds = array<i64: 1, 32>}, {pipeline_mode = #tpu.pipeline_mode<synchronous>, transform_indices = @transform_8, window_bounds = array<i64: 1, 32>}, {transform_indices = @transform_9, window_bounds = array<i64: 1, 4, 8, 8>}, {transform_indices = @transform_10, window_bounds = array<i64: 1, 4, 8, 8>}, {transform_indices = @transform_11, window_bounds = array<i64: 1, 4, 8, 8>}]} {
    %c0 = arith.constant 0 : index
    %c0_0 = arith.constant 0 : index
    %c0_1 = arith.constant 0 : index
    %0 = vector.load %arg2[%c0, %c0_0, %c0_1] : memref<1x8x32xbf16, #tpu.memory_space<vmem>>, vector<1x8x32xbf16>
    %1 = vector.shape_cast %0 : vector<1x8x32xbf16> to vector<8x32xbf16>
    %c0_2 = arith.constant 0 : index
    %c0_3 = arith.constant 0 : index
    %2 = vector.load %arg3[%c0_2, %c0_3] : memref<32x32xbf16, #tpu.memory_space<vmem>>, vector<32x32xbf16>
    %cst = arith.constant dense<0.000000e+00> : vector<8x32xf32>
    %3 = tpu.matmul %1, %2, %cst {dimension_numbers = #tpu.dot_dimension_numbers<[1], [0], [0], [1], [0, 0, 1, 1], [], []>} : vector<8x32xbf16>, vector<32x32xbf16>, vector<8x32xf32> -> vector<8x32xf32>
    %c0_4 = arith.constant 0 : index
    %c0_5 = arith.constant 0 : index
    %4 = vector.load %arg6[%c0_4, %c0_5] : memref<1x32xf32, #tpu.memory_space<vmem>>, vector<1x32xf32>
    %5 = vector.broadcast %4 : vector<1x32xf32> to vector<8x32xf32>
    %6 = arith.addf %3, %5 : vector<8x32xf32>
    %c0_6 = arith.constant 0 : index
    %c0_7 = arith.constant 0 : index
    %7 = vector.load %arg9[%c0_6, %c0_7] : memref<1x32xf32, #tpu.memory_space<vmem>>, vector<1x32xf32>
    %8 = arith.mulf %6, %6 : vector<8x32xf32>
    %cst_8 = arith.constant dense<0.000000e+00> : vector<8xf32>
    %9 = vector.multi_reduction <add>, %8, %cst_8 [1] : vector<8x32xf32> to vector<8xf32>
    %10 = vector.shape_cast %9 : vector<8xf32> to vector<8x1xf32>
    %cst_9 = arith.constant 1.000000e-24 : f32
    %11 = vector.broadcast %cst_9 : f32 to vector<8x1xf32>
    %12 = arith.maximumf %10, %11 : vector<8x1xf32>
    %13 = math.rsqrt %12 : vector<8x1xf32>
    %14 = vector.broadcast %13 : vector<8x1xf32> to vector<8x32xf32>
    %15 = arith.mulf %6, %14 : vector<8x32xf32>
    %16 = vector.broadcast %7 : vector<1x32xf32> to vector<8x32xf32>
    %17 = arith.mulf %15, %16 : vector<8x32xf32>
    %18 = vector.shape_cast %17 : vector<8x32xf32> to vector<8x4x8xf32>
    %19 = tpu.transpose %18, [1, 0, 2] : vector<8x4x8xf32> -> vector<4x8x8xf32>
    %20 = arith.truncf %19 : vector<4x8x8xf32> to vector<4x8x8xbf16>
    %c0_10 = arith.constant 0 : index
    %c0_11 = arith.constant 0 : index
    %c0_12 = arith.constant 0 : index
    %c0_13 = arith.constant 0 : index
    %21 = vector.load %arg11[%c0_10, %c0_11, %c0_12, %c0_13] : memref<1x4x8x8xbf16, #tpu.memory_space<vmem>>, vector<1x4x8x8xbf16>
    %22 = vector.shape_cast %21 : vector<1x4x8x8xbf16> to vector<4x8x8xbf16>
    %23 = vector.shape_cast %20 : vector<4x8x8xbf16> to vector<1x4x8x8xbf16>
    tpu.vector_store %arg11[%c0_10, %c0_11, %c0_12, %c0_13], %23 {strides = array<i32>} : memref<1x4x8x8xbf16, #tpu.memory_space<vmem>>, vector<1x4x8x8xbf16>,
    %c0_14 = arith.constant 0 : index
    %c0_15 = arith.constant 0 : index
    %24 = vector.load %arg4[%c0_14, %c0_15] : memref<32x32xbf16, #tpu.memory_space<vmem>>, vector<32x32xbf16>
    %cst_16 = arith.constant dense<0.000000e+00> : vector<8x32xf32>
    %25 = tpu.matmul %1, %24, %cst_16 {dimension_numbers = #tpu.dot_dimension_numbers<[1], [0], [0], [1], [0, 0, 1, 1], [], []>} : vector<8x32xbf16>, vector<32x32xbf16>, vector<8x32xf32> -> vector<8x32xf32>
    %c0_17 = arith.constant 0 : index
    %c0_18 = arith.constant 0 : index
    %26 = vector.load %arg7[%c0_17, %c0_18] : memref<1x32xf32, #tpu.memory_space<vmem>>, vector<1x32xf32>
    %27 = vector.broadcast %26 : vector<1x32xf32> to vector<8x32xf32>
    %28 = arith.addf %25, %27 : vector<8x32xf32>
    %c0_19 = arith.constant 0 : index
    %c0_20 = arith.constant 0 : index
    %29 = vector.load %arg10[%c0_19, %c0_20] : memref<1x32xf32, #tpu.memory_space<vmem>>, vector<1x32xf32>
    %30 = arith.mulf %28, %28 : vector<8x32xf32>
    %cst_21 = arith.constant dense<0.000000e+00> : vector<8xf32>
    %31 = vector.multi_reduction <add>, %30, %cst_21 [1] : vector<8x32xf32> to vector<8xf32>
    %32 = vector.shape_cast %31 : vector<8xf32> to vector<8x1xf32>
    %cst_22 = arith.constant 1.000000e-24 : f32
    %33 = vector.broadcast %cst_22 : f32 to vector<8x1xf32>
    %34 = arith.maximumf %32, %33 : vector<8x1xf32>
    %35 = math.rsqrt %34 : vector<8x1xf32>
    %36 = vector.broadcast %35 : vector<8x1xf32> to vector<8x32xf32>
    %37 = arith.mulf %28, %36 : vector<8x32xf32>
    %38 = vector.broadcast %29 : vector<1x32xf32> to vector<8x32xf32>
    %39 = arith.mulf %37, %38 : vector<8x32xf32>
    %40 = vector.shape_cast %39 : vector<8x32xf32> to vector<8x4x8xf32>
    %41 = tpu.transpose %40, [1, 0, 2] : vector<8x4x8xf32> -> vector<4x8x8xf32>
    %42 = arith.truncf %41 : vector<4x8x8xf32> to vector<4x8x8xbf16>
    %c0_23 = arith.constant 0 : index
    %c0_24 = arith.constant 0 : index
    %c0_25 = arith.constant 0 : index
    %c0_26 = arith.constant 0 : index
    %43 = vector.load %arg12[%c0_23, %c0_24, %c0_25, %c0_26] : memref<1x4x8x8xbf16, #tpu.memory_space<vmem>>, vector<1x4x8x8xbf16>
    %44 = vector.shape_cast %43 : vector<1x4x8x8xbf16> to vector<4x8x8xbf16>
    %45 = vector.shape_cast %42 : vector<4x8x8xbf16> to vector<1x4x8x8xbf16>
    tpu.vector_store %arg12[%c0_23, %c0_24, %c0_25, %c0_26], %45 {strides = array<i32>} : memref<1x4x8x8xbf16, #tpu.memory_space<vmem>>, vector<1x4x8x8xbf16>,
    %c0_27 = arith.constant 0 : index
    %c0_28 = arith.constant 0 : index
    %46 = vector.load %arg5[%c0_27, %c0_28] : memref<32x32xbf16, #tpu.memory_space<vmem>>, vector<32x32xbf16>
    %cst_29 = arith.constant dense<0.000000e+00> : vector<8x32xf32>
    %47 = tpu.matmul %1, %46, %cst_29 {dimension_numbers = #tpu.dot_dimension_numbers<[1], [0], [0], [1], [0, 0, 1, 1], [], []>} : vector<8x32xbf16>, vector<32x32xbf16>, vector<8x32xf32> -> vector<8x32xf32>
    %c0_30 = arith.constant 0 : index
    %c0_31 = arith.constant 0 : index
    %48 = vector.load %arg8[%c0_30, %c0_31] : memref<1x32xf32, #tpu.memory_space<vmem>>, vector<1x32xf32>
    %49 = vector.broadcast %48 : vector<1x32xf32> to vector<8x32xf32>
    %50 = arith.addf %47, %49 : vector<8x32xf32>
    %51 = vector.shape_cast %50 : vector<8x32xf32> to vector<8x4x8xf32>
    %52 = tpu.transpose %51, [1, 0, 2] : vector<8x4x8xf32> -> vector<4x8x8xf32>
    %53 = arith.truncf %52 : vector<4x8x8xf32> to vector<4x8x8xbf16>
    %c0_32 = arith.constant 0 : index
    %c0_33 = arith.constant 0 : index
    %c0_34 = arith.constant 0 : index
    %c0_35 = arith.constant 0 : index
    %54 = vector.load %arg13[%c0_32, %c0_33, %c0_34, %c0_35] : memref<1x4x8x8xbf16, #tpu.memory_space<vmem>>, vector<1x4x8x8xbf16>
    %55 = vector.shape_cast %54 : vector<1x4x8x8xbf16> to vector<4x8x8xbf16>
    %56 = vector.shape_cast %53 : vector<4x8x8xbf16> to vector<1x4x8x8xbf16>
    tpu.vector_store %arg13[%c0_32, %c0_33, %c0_34, %c0_35], %56 {strides = array<i32>} : memref<1x4x8x8xbf16, #tpu.memory_space<vmem>>, vector<1x4x8x8xbf16>,
    return
  }
  func.func @transform_0(%arg0: i32, %arg1: i32) -> (i32, i32, i32) {
    %c0_i32 = arith.constant 0 : i32
    %c0_i32_0 = arith.constant 0 : i32
    return %arg0, %arg1, %c0_i32 : i32, i32, i32
  }
  func.func @transform_1(%arg0: i32, %arg1: i32) -> (i32, i32) {
    %c0_i32 = arith.constant 0 : i32
    %c0_i32_0 = arith.constant 0 : i32
    %c0_i32_1 = arith.constant 0 : i32
    return %c0_i32, %c0_i32_0 : i32, i32
  }
  func.func @transform_2(%arg0: i32, %arg1: i32) -> (i32, i32) {
    %c0_i32 = arith.constant 0 : i32
    %c0_i32_0 = arith.constant 0 : i32
    %c0_i32_1 = arith.constant 0 : i32
    return %c0_i32, %c0_i32_0 : i32, i32
  }
  func.func @transform_3(%arg0: i32, %arg1: i32) -> (i32, i32) {
    %c0_i32 = arith.constant 0 : i32
    %c0_i32_0 = arith.constant 0 : i32
    %c0_i32_1 = arith.constant 0 : i32
    return %c0_i32, %c0_i32_0 : i32, i32
  }
  func.func @transform_4(%arg0: i32, %arg1: i32) -> (i32, i32) {
    %c0_i32 = arith.constant 0 : i32
    %c0_i32_0 = arith.constant 0 : i32
    %c0_i32_1 = arith.constant 0 : i32
    return %c0_i32, %c0_i32_0 : i32, i32
  }
  func.func @transform_5(%arg0: i32, %arg1: i32) -> (i32, i32) {
    %c0_i32 = arith.constant 0 : i32
    %c0_i32_0 = arith.constant 0 : i32
    %c0_i32_1 = arith.constant 0 : i32
    return %c0_i32, %c0_i32_0 : i32, i32
  }
  func.func @transform_6(%arg0: i32, %arg1: i32) -> (i32, i32) {
    %c0_i32 = arith.constant 0 : i32
    %c0_i32_0 = arith.constant 0 : i32
    %c0_i32_1 = arith.constant 0 : i32
    return %c0_i32, %c0_i32_0 : i32, i32
  }
  func.func @transform_7(%arg0: i32, %arg1: i32) -> (i32, i32) {
    %c0_i32 = arith.constant 0 : i32
    %c0_i32_0 = arith.constant 0 : i32
    %c0_i32_1 = arith.constant 0 : i32
    return %c0_i32, %c0_i32_0 : i32, i32
  }
  func.func @transform_8(%arg0: i32, %arg1: i32) -> (i32, i32) {
    %c0_i32 = arith.constant 0 : i32
    %c0_i32_0 = arith.constant 0 : i32
    %c0_i32_1 = arith.constant 0 : i32
    return %c0_i32, %c0_i32_0 : i32, i32
  }
  func.func @transform_9(%arg0: i32, %arg1: i32) -> (i32, i32, i32, i32) {
    %c0_i32 = arith.constant 0 : i32
    %c0_i32_0 = arith.constant 0 : i32
    %c0_i32_1 = arith.constant 0 : i32
    return %arg0, %c0_i32, %arg1, %c0_i32_0 : i32, i32, i32, i32
  }
  func.func @transform_10(%arg0: i32, %arg1: i32) -> (i32, i32, i32, i32) {
    %c0_i32 = arith.constant 0 : i32
    %c0_i32_0 = arith.constant 0 : i32
    %c0_i32_1 = arith.constant 0 : i32
    return %arg0, %c0_i32, %arg1, %c0_i32_0 : i32, i32, i32, i32
  }
  func.func @transform_11(%arg0: i32, %arg1: i32) -> (i32, i32, i32, i32) {
    %c0_i32 = arith.constant 0 : i32
    %c0_i32_0 = arith.constant 0 : i32
    %c0_i32_1 = arith.constant 0 : i32
    return %arg0, %c0_i32, %arg1, %c0_i32_0 : i32, i32, i32, i32
  }
}

</mosaic_0001>

<bundles_post_ra>
// kernel: tpu_custom_call.1
= control target key start
LH: loop header
LB: loop body
LE: loop exit
PB: predicated region body
PF: predicated region fallthrough
CT: control target
= control target key end

     0   :  { %s2246_s0 = inlined_call_operand.hbm [shape: bf16[2,8,32], index: 0, kind: input, shape index: {}]   ;;  %s2247_s1 = inlined_call_operand.hbm [shape: bf16[32,32], index: 1, kind: input, shape index: {}]   ;;  %s2248_s2 = inlined_call_operand.hbm [shape: bf16[32,32], index: 2, kind: input, shape index: {}]   ;;  %s2249_s3 = inlined_call_operand.hbm [shape: bf16[32,32], index: 3, kind: input, shape index: {}]   ;;  %s2250_s4 = inlined_call_operand.vmem [shape: f32[1,32], index: 4, kind: input, shape index: {}]   ;;  %s2251_s5 = inlined_call_operand.vmem [shape: f32[1,32], index: 5, kind: input, shape index: {}]   ;;  %s2252_s6 = inlined_call_operand.vmem [shape: f32[1,32], index: 6, kind: input, shape index: {}]   ;;  %s2253_s7 = inlined_call_operand.vmem [shape: f32[1,32], index: 7, kind: input, shape index: {}]   ;;  %s2254_s8 = inlined_call_operand.vmem [shape: f32[1,32], index: 8, kind: input, shape index: {}]   ;;  %s2255_s9 = inlined_call_operand.hbm [shape: bf16[2,4,8,8], index: 9, kind: output, shape index: {0}]   ;;  %s2256_s10 = inlined_call_operand.hbm [shape: bf16[2,4,8,8], index: 10, kind: output, shape index: {1}]   ;;  %s2257_s11 = inlined_call_operand.hbm [shape: bf16[2,4,8,8], index: 11, kind: output, shape index: {2}]  }
   0x1   :  { %2263 = sst [smem:[#allocation23_spill]] %s2246_s0 }
   0x2   :  { %2264 = sst [smem:[#allocation24_spill]] %s2247_s1 }
   0x3   :  { %2265 = sst [smem:[#allocation25_spill]] %s2248_s2 }
   0x4   :  { %2266 = sst [smem:[#allocation26_spill]] %s2249_s3 }
   0x5   :  { %2267 = sst [smem:[#allocation27_spill]] %s2250_s4 }
   0x6   :  { %17 = vsyncpa [#allocation3], 0 }
   0x7   :  { %19 = vsyncpa [#allocation3 + $0x1], 0 }
   0x8   :  { %20 = vsyncpa [#allocation6], 0 }
   0x9   :  { %21 = vsyncpa [#allocation9], 0 }
   0xa   :  { %22 = vsyncpa [#allocation4], 0 }
   0xb   :  { %24 = vsyncpa [#allocation4 + $0x1], 0 }
   0xc   :  { %25 = vsyncpa [#allocation12], 0 }
   0xd   :  { %27 = vsyncpa [#allocation12 + $0x1], 0  ;;  %s1813_s17 = smov 0   ;;  %s1815_s18 = smov 0  }
   0xe   :  { %s1817_s19 = smov 0   ;;  %s1819_s20 = smov 0  }
   0xf   :  { %s1821_s21 = smov 0   ;;  %s1823_s22 = smov 0  }
  0x10 LB: > { %2268 = sst [smem:[#allocation19_spill]] %s1719_s17  ;;  %s1844_s23 = sadd.s32 4294967295, %s1739_s22   ;;  %s1739_s22 = sphi %s1823_s22, %s33_s22   ;;  %s1735_s21 = sphi %s1821_s21, %s2294_s21   ;;  %s1731_s20 = sphi %s1819_s20, %s2293_s20   ;;  %s1727_s19 = sphi %s1817_s19, %s2292_s19   ;;  %s1723_s18 = sphi %s1815_s18, %s2291_s18   ;;  %s1719_s17 = sphi %s1813_s17, %s2290_s17  }
  0x11   : > { %p1271_p0 = scmp.ge.s32.totalorder %s1739_s22, 1  ;;  %p68_p1 = scmp.eq.s32.totalorder %s1844_s23, 0 }
  0x12   : > { %p330_p2 = scmp.lt.s32.totalorder %s1739_s22, 3  ;;  %s2269_s1 = sld [smem:[#allocation24_spill]] }
  0x13   : > { %s1741_s28 = smov [#allocation5]   ;;  %p1275_p6 = scmp.ge.s32.totalorder %s1739_s22, 2 }
  0x14   : > { %p1852_p3 = pnand %p1271_p0, %p330_p2  ;;  %s343_s29 = sshll.u32 %s1741_s28, 4  ;;  %s344_s29 = int_to_ptr.vmem [resolvable:$true] %s343_s29 }
  0x15   : > { %s2272_s2 = sld [smem:[#allocation25_spill]]  ;;  %s1742_s15 = smov 64  }
  0x16   : > { %p1353_p4 = pneg %p1852_p3  ;;  %s1743_s16 = smov 4  }
  0x17   : > { %s1744_s24 = smov [#allocation7]   ;;  %s2273_s3 = sld [smem:[#allocation26_spill]] }
  0x18   : > { %s341_s26 = sshll.u32 %s2269_s1, 4  ;;  %p1860_p5 = pnand %p1353_p4, %p68_p1  ;;  %s342_s26 = int_to_ptr.hbm [resolvable:$true] %s341_s26 }
  0x19   : > { %s357_s25 = sshll.u32 %s1744_s24, 4  ;;  %s1745_s13 = smov [#allocation8]   ;;  %s358_s25 = int_to_ptr.vmem [resolvable:$true] %s357_s25 }
  0x1a   : > { %1356 = dma.hbm_to_vmem [thread:$0]  (!%p1860_p5), %s342_s26, 256, %s344_s29, [#allocation6], %s1742_s15, %s1742_s15, %s1743_s16  }
  0x1b   : > { %s355_s14 = sshll.u32 %s2272_s2, 4  ;;  %s371_s2 = sshll.u32 %s1745_s13, 4  ;;  %s356_s14 = int_to_ptr.hbm [resolvable:$true] %s355_s14  ;;  %s372_s2 = int_to_ptr.vmem [resolvable:$true] %s371_s2 }
  0x1c   : > { %1359 = dma.hbm_to_vmem [thread:$0]  (!%p1860_p5), %s356_s14, 256, %s358_s25, [#allocation6], %s1742_s15, %s1742_s15, %s1743_s16  }
  0x1d   : > { %s369_s12 = sshll.u32 %s2273_s3, 4  ;;  %s2259_s26 = sadd.s32 4294967294, %s1739_s22   ;;  %s370_s12 = int_to_ptr.hbm [resolvable:$true] %s369_s12 }
  0x1e   : > { %1362 = dma.hbm_to_vmem [thread:$0]  (!%p1860_p5), %s370_s12, 256, %s372_s2, [#allocation9], %s1742_s15, %s1742_s15, %s1743_s16  }
  0x1f   : > { %s45_s29 = sadd.s32 1, %s1735_s21  ;;  %s54_s24 = sadd.s32 1, %s1727_s19 }
  0x20   : > { %p47_p7 = scmp.ge.s32.totalorder %s45_s29, 2  ;;  %p61_p8 = scmp.ne.s32.totalorder %s1727_s19, %s1723_s18 }
  0x21   : > { %p62_p9 = scmp.eq.s32.totalorder %s1739_s22, 0  ;;  %p67_p10 = scmp.ne.s32.totalorder %s1723_s18, %s1719_s17 }
  0x22   : > { %s2296_s29 = smov (%p47_p7, %s45_s29), 0  ;;  %p261_p13 = scmp.eq.s32.totalorder %s1844_s23, 1 }
  0x23   : > { %2274 = sst [smem:[#allocation20_spill]] %s2296_s29  ;;  %p1887_p11 = por %p62_p9, %p61_p8 }
  0x24   : > { %p1893_p12 = por %p68_p1, %p67_p10  ;;  %s49_s30 = ssub.s32 %s1735_s21, %s2296_s29 }
  0x25   : > { %p52_p0 = scmp.eq.s32.totalorder %s49_s30, 0  ;;  %p267_p2 = scmp.eq.s32.totalorder %s2259_s26, 1 }
  0x26   : > { %p1902_p4 = por %p261_p13, %p61_p8  ;;  %p1380_p5 = scmp.lt.s32.totalorder %s1739_s22, 2 }
  0x27   : > { %s1908_s15 = scalar_select %p52_p0, %s1727_s19, %s54_s24  }
  0x28   : > { %p1910_p7 = por %p267_p2, %p67_p10  ;;  %s400_s25 = sand.u32 1, %s1727_s19  }
  0x29   : > { %2278 = sst [smem:[#allocation21_spill]] %s1908_s15  ;;  %s1276_s28 = sshll.u32 %s400_s25, 2 }
  0x2a   : > { %s1277_s12 = sshll.u32 %s1735_s21, 2  ;;  %s2280_s0 = sld [smem:[#allocation23_spill]] }
  0x2b   : > { %s404_s29 = scalar_lea.vmem [#allocation2], %s1276_s28  ;;  %p1364_p8 = pnand %p1380_p5, %p1887_p11 }
  0x2c   : > { %s413_s26 = sshll.u32 %s404_s29, 4  ;;  %s401_s24 = scalar_lea.sflag [#allocation3], %s400_s25  ;;  %s414_s26 = int_to_ptr.vmem [resolvable:$true] %s413_s26 }
  0x2e   : > { %422 = sbr.rel (%p1852_p3) target bundleno = 543 (0x21f), region = 56 }
  0x30   : > { %s409_s30 = scalar_lea.hbm %s2280_s0, %s1277_s12 }
  0x31   : > { %s411_s17 = sshll.u32 %s409_s30, 4  ;;  %s412_s17 = int_to_ptr.hbm [resolvable:$true] %s411_s17 }
  0x32   : > { %1366 = dma.hbm_to_vmem [thread:$0]  (!%p1364_p8), %s412_s17, 64, %s414_s26, %s401_s24  }
  0x33   : > { %s1924_s15 = sand.u32 1, %s1723_s18  }
  0x34   : > { %s1279_s3 = sshll.u32 %s1924_s15, 2  ;;  %s425_s12 = scalar_lea.sflag [#allocation3], %s1924_s15 }
  0x35   : > { %s428_s28 = scalar_lea.vmem [#allocation2], %s1279_s3 }
  0x36   : > { %1698 = dma.done.wait (%p1893_p12), %s425_s12, 64  }
  0x37   : > { %1700 = vsyncadd (%p1893_p12), %s425_s12, 4294967232 }
  0x38   : > { %1702 = dma.done.wait (%p68_p1), [#allocation6], 512  }
  0x39   : > { %1704 = vsyncadd (%p68_p1), [#allocation6], 4294966784 }
  0x3a   : > { %1706 = dma.done.wait (%p68_p1), [#allocation9], 256  }
  0x3b   : > { %1708 = vsyncadd (%p68_p1), [#allocation9], 4294967040  ;;  %v1325_v0 = vld [vmem:[#allocation5 + $0x8] sm:$0xff]  ;;  %v1327_v1 = vld [vmem:[#allocation7 + $0x8] sm:$0xff]  ;;  %vm515_vm0 = vcmask 261120   ;;  %s2281_s4 = sld [smem:[#allocation27_spill]] }
  0x3c   : > { %v1324_v2 = vld [vmem:[#allocation5] sm:$0xff]  ;;  %v1329_v3 = vld [vmem:[#allocation8 + $0x8] sm:$0xff]  ;;  %525 = vmatpush.bf16.msra.mxu0 %v1325_v0  ;;  %709 = vmatpush.bf16.msra.mxu1 %v1327_v1  ;;  %v1326_v4 = vld [vmem:[#allocation7] sm:$0xff]  ;;  %s1746_s25 = smov 112   ;;  %s1747_s13 = smov 120   ;;  %vm564_vm7 = vcmask 1047556  }
  0x3d   : > { %v1328_v5 = vld [vmem:[#allocation8] sm:$0xff]  ;;  %891 = vmatpush.bf16.msra.mxu2 %v1329_v3  ;;  %v494_v6 = vld [vmem:[%s428_s28] sm:$0xf]  ;;  %s1748_s28 = smov 104   ;;  %v1749_v55 = vmov 1983009808  }
  0x3e   : > { %v1461_v7 = vld [vmem:[%s2251_s5] ss:$0 sm:$0xff]  ;;  %v569_v56 = vunpack.c.l.s4 %v1749_v55  ;;  %s2056_s17 = sshll.u32 %s1731_s20, 4  ;;  %s2062_s27 = sshll.u32 %s1924_s15, 4  ;;  %vm678_vm8 = vcmask 60416  }
  0x3f   : > { %v1462_v14 = vld [vmem:[%s2252_s6] ss:$0 sm:$0xff]  ;;  %s1031_s26 = sand.u32 1, %s1844_s23   ;;  %s1067_s1 = scalar_lea.hbm %s2256_s10, %s2056_s17 }
  0x40   : > { %526 = vmatpush.bf16.msra.mxu0 %v1324_v2  ;;  %710 = vmatpush.bf16.msra.mxu1 %v1326_v4  ;;  %v1463_v40 = vld [vmem:[%s2254_s8] ss:$0 sm:$0xff]  ;;  %v1972_v1 = vunpack.c.0.s8 %v569_v56  ;;  %v1750_v4 = vmov 1934713408   ;;  %s2081_s2 = scalar_lea.vmem [#allocation10], %s2062_s27  ;;  %s1049_s30 = scalar_lea.hbm %s2255_s9, %s2056_s17 }
  0x41   : > { %892 = vmatpush.bf16.msra.mxu2 %v1328_v5  ;;  %v1460_v8 = vld [vmem:[%s2281_s4] ss:$0 sm:$0xff]  ;;  %v593_v5 = vunpack.c.l.s4 %v1750_v4  ;;  %s485_s24 = scalar_lea.vmem [#allocation11], %s2062_s27  ;;  %s2091_s12 = sshll.u32 %s1067_s1, 4  ;;  %s1071_s12 = int_to_ptr.hbm [resolvable:$true] %s2091_s12 }
  0x42   : > { %v1464_v42 = vld [vmem:[%s2253_s7] ss:$0 sm:$0xff]  ;;  %s1068_s3 = sshll.u32 %s485_s24, 4  ;;  %s2110_s20 = sshll.u32 %s1049_s30, 4  ;;  %s2118_s3 = int_to_ptr.vmem [resolvable:$true] %s1068_s3 }
  0x43   : > { %1294 = vmatmul.msk.bf16.vlgmr.msra.gmra.mxu0 %vm515_vm0, %v494_v6  ;;  %1303 = vmatmul.msk.bf16.vlgmr.msra.gmra.mxu1 %vm515_vm0, %v494_v6  ;;  %2282 = sst [smem:[#allocation22_spill]] %s2110_s20  ;;  %s2132_s29 = scalar_lea.sflag [#allocation12], %s1031_s26 }
  0x44   : > { %1312 = vmatmul.msk.bf16.vlgmr.msra.gmra.mxu2 %vm515_vm0, %v494_v6  ;;  %s1603_s1 = sshra.s32 %s1071_s12, 4  ;;  %s1604_s1 = int_to_ptr.hbm [resolvable:$true] %s1603_s1 }
  0x45   : > { %p1610_p10 = scmp.lt.s32.totalorder %s1604_s1, %s2256_s10 }
  0xc0   : > { %v528_v9 = vpop.f32.mrf.mxu0  ;;  %v712_v10 = vpop.f32.mrf.mxu1 }
  0xc1   : > { %v713_v11 = vadd.f32 %v1461_v7, %v712_v10  ;;  %v529_v12 = vadd.f32 %v1460_v8, %v528_v9 }
  0xc3   : > { %v717_v13 = vmul.f32 %v713_v11, %v713_v11  ;;  %v533_v16 = vmul.f32 %v529_v12, %v529_v12 }
  0xc5   : > { %v718_v15 = vsel %vm515_vm0, %v717_v13, 0.0  ;;  %v534_v21 = vsel %vm515_vm0, %v533_v16, 0.0 }
  0xc6   : > { %719 = vadd.xlane.f32.xlu0 %v718_v15 }
  0xc7   : > { %v894_v17 = vpop.f32.mrf.mxu2 }
  0xc8   : > { %v530_v18 = vpop.f32.mrf.mxu0  ;;  %v714_v19 = vpop.f32.mrf.mxu1  ;;  %v1953_v20 = vadd.f32 %v1462_v14, %v894_v17 }
  0xc9   : > { %v1989_v19 = vunpack.c.0.s8 %v593_v5 }
  0xca   : > { %902 = vrot.lane.b32.xlu1 %v1953_v20, %s1746_s25  ;;  %v910_v57 = vrot.slane %v1953_v20, 4 }
  0xce   : > { %535 = vadd.xlane.f32.xlu0 %v534_v21 }
  0xcf   : > { %v896_v22 = vpop.f32.mrf.mxu2 }
  0xe2   : > { %899 = vrot.lane.b32.xlu0 %v1953_v20, %s1747_s13 }
 0x139   : > { %v720_v23 = vpop.xlane.xlu0 %719 }
 0x13a   : > { %v721_v24 = vmax.f32 %v720_v23, 1e-24 }
 0x13c   : > { %1465 = vrsqrt.f32 %v721_v24  ;;  %vm728_vm2 = vweird.f32 %v721_v24  ;;  %v903_v54 = vpop.permute.xlu1 %902 }
 0x13d   : > { %v908_v60 = vrot.slane %v903_v54, 4  ;;  %v911_v7 = vsel %vm564_vm7, %v903_v54, %v910_v57 }
 0x13e   : > { %v1987_v18 = vperm.slane %v911_v7, %v1972_v1 }
 0x13f   : > { %v909_v6 = vsel %vm564_vm7, %v908_v60, %v1953_v20 }
 0x140   : > { %v1984_v17 = vperm.slane %v909_v6, %v1972_v1 }
 0x141   : > { %v536_v25 = vpop.xlane.xlu0 %535 }
 0x142   : > { %v1466_v26 = vpop.eup %1465  ;;  %v537_v27 = vmax.f32 %v536_v25, 1e-24 }
 0x143   : > { %v723_v28 = vmul.f32 %v1466_v26, %v721_v24  ;;  %vm729_vm1 = vweird.f32 %v1466_v26 }
 0x144   : > { %1467 = vrsqrt.f32 %v537_v27  ;;  %vm730_vm3 = vmor %vm728_vm2, %vm729_vm1  ;;  %vm544_vm5 = vweird.f32 %v537_v27 }
 0x145   : > { %v724_v29 = vmul.f32 %v1466_v26, %v723_v28 }
 0x147   : > { %v725_v30 = vmul.f32 0.5, %v724_v29 }
 0x149   : > { %v726_v31 = vsub.f32 1.5, %v725_v30 }
 0x14a   : > { %v1468_v32 = vpop.eup %1467 }
 0x14b   : > { %v539_v33 = vmul.f32 %v1468_v32, %v537_v27  ;;  %v727_v34 = vmul.f32 %v1466_v26, %v726_v31  ;;  %vm545_vm4 = vweird.f32 %v1468_v32 }
 0x14c   : > { %vm546_vm6 = vmor %vm544_vm5, %vm545_vm4 }
 0x14d   : > { %v540_v35 = vmul.f32 %v1468_v32, %v539_v33  ;;  %v731_v37 = vsel %vm730_vm3, %v1466_v26, %v727_v34 }
 0x14e   : > { %v732_v41 = vmul.f32 %v731_v37, %v713_v11 }
 0x14f   : > { %v541_v36 = vmul.f32 0.5, %v540_v35 }
 0x150   : > { %v736_v45 = vmul.f32 %v1463_v40, %v732_v41 }
 0x151   : > { %v542_v38 = vsub.f32 1.5, %v541_v36  ;;  %v946_v36 = vrot.slane %v1987_v18, 4 }
 0x152   : > { %v749_v10 = vrot.slane %v736_v45, 4 }
 0x153   : > { %v543_v39 = vmul.f32 %v1468_v32, %v542_v38 }
 0x155   : > { %v547_v43 = vsel %vm546_vm6, %v1468_v32, %v543_v39 }
 0x156   : > { %v548_v44 = vmul.f32 %v547_v43, %v529_v12 }
 0x158   : > { %v552_v46 = vmul.f32 %v1464_v42, %v548_v44 }
 0x15a   : > { %v1450_v47 = vpack.i.bf16 %v552_v46, %v736_v45  ;;  %v566_v12 = vrot.slane %v552_v46, 4 }
 0x15c   : > { %1451 = vrot.lane.b32.xlu2 %v1450_v47, %s1747_s13  ;;  %1446 = vrot.lane.b32.xlu1 %v1450_v47, %s1746_s25  ;;  %s1605_s25 = scalar_lea.hbm %s1604_s1, 16 }
 0x15d   : > { %p1606_p1 = scmp.ne.s32.totalorder %s1604_s1, %s1605_s25 }
 0x15f   : > { %p1607_p3 = pnand %p1606_p1, %p1902_p4 }
 0x161   : > { %p1608_p9 = pneg %p1607_p3 }
 0x164   : > { %1456 = vrot.lane.b32.xlu2 %v1450_v47, %s1748_s28  ;;  %905 = vrot.lane.b32.xlu1 %v1953_v20, %s1748_s28  ;;  %s1050_s28 = sshll.u32 %s2081_s2, 4  ;;  %s2124_s28 = int_to_ptr.vmem [resolvable:$true] %s1050_s28 }
 0x1b6   : > { %v1452_v48 = vpop.permute.xlu2 %1451 }
 0x1b7   : > { %v1454_v52 = vunpack.i.h.bf16 %v1452_v48  ;;  %v1453_v53 = vunpack.i.l.bf16 %v1452_v48 }
 0x1b9   : > { %v578_v61 = vrot.slane %v1454_v52, 4  ;;  %v761_v62 = vrot.slane %v1453_v53, 4 }
 0x1be   : > { %v1457_v49 = vpop.permute.xlu2 %1456 }
 0x1bf   : > { %v1459_v50 = vunpack.i.h.bf16 %v1457_v49  ;;  %v1458_v51 = vunpack.i.l.bf16 %v1457_v49 }
 0x1c1   : > { %v576_v58 = vrot.slane %v1459_v50, 4  ;;  %v759_v59 = vrot.slane %v1458_v51, 4  ;;  %v579_v63 = vsel %vm564_vm7, %v1459_v50, %v578_v61  ;;  %v762_v0 = vsel %vm564_vm7, %v1458_v51, %v761_v62 }
 0x1c2   : > { %v587_v8 = vperm.slane %v579_v63, %v1972_v1  ;;  %v770_v9 = vperm.slane %v762_v0, %v1972_v1 }
 0x1c3   : > { %v577_v2 = vsel %vm564_vm7, %v576_v58, %v1454_v52  ;;  %v760_v3 = vsel %vm564_vm7, %v759_v59, %v1453_v53  ;;  %v934_v52 = vrot.slane %v1984_v17, 4 }
 0x1c4   : > { %v583_v13 = vperm.slane %v577_v2, %v1972_v1  ;;  %v766_v14 = vperm.slane %v760_v3, %v1972_v1  ;;  %v600_v24 = vrot.slane %v587_v8, 4  ;;  %v783_v25 = vrot.slane %v770_v9, 4 }
 0x1c6   : > { %v588_v28 = vrot.slane %v583_v13, 4  ;;  %v771_v29 = vrot.slane %v766_v14, 4 }
 0x1ce   : > { %v1447_v11 = vpop.permute.xlu1 %1446 }
 0x1cf   : > { %v1449_v15 = vunpack.i.h.bf16 %v1447_v11  ;;  %v1448_v16 = vunpack.i.l.bf16 %v1447_v11 }
 0x1d1   : > { %v563_v20 = vrot.slane %v1449_v15, 4  ;;  %v567_v21 = vsel %vm564_vm7, %v1449_v15, %v566_v12  ;;  %v747_v22 = vrot.slane %v1448_v16, 4  ;;  %v750_v23 = vsel %vm564_vm7, %v1448_v16, %v749_v10 }
 0x1d2   : > { %v575_v26 = vperm.slane %v567_v21, %v1972_v1  ;;  %v758_v27 = vperm.slane %v750_v23, %v1972_v1 }
 0x1d3   : > { %v565_v30 = vsel %vm564_vm7, %v563_v20, %v552_v46  ;;  %v748_v31 = vsel %vm564_vm7, %v747_v22, %v736_v45 }
 0x1d4   : > { %v571_v32 = vperm.slane %v565_v30, %v1972_v1  ;;  %v601_v33 = vsel %vm564_vm7, %v600_v24, %v575_v26  ;;  %v602_v34 = vrot.slane %v575_v26, 4  ;;  %v754_v35 = vperm.slane %v748_v31, %v1972_v1 }
 0x1d5   : > { %v607_v37 = vperm.slane %v601_v33, %v1989_v19  ;;  %v784_v38 = vsel %vm564_vm7, %v783_v25, %v758_v27  ;;  %v785_v39 = vrot.slane %v758_v27, 4 }
 0x1d6   : > { %v589_v40 = vsel %vm564_vm7, %v588_v28, %v571_v32  ;;  %v590_v41 = vrot.slane %v571_v32, 4  ;;  %v603_v42 = vsel %vm564_vm7, %v587_v8, %v602_v34  ;;  %v772_v43 = vsel %vm564_vm7, %v771_v29, %v754_v35 }
 0x1d7   : > { %v595_v44 = vperm.slane %v589_v40, %v1989_v19  ;;  %v611_v45 = vperm.slane %v603_v42, %v1989_v19  ;;  %v616_v46 = vrot.slane %v607_v37, 4  ;;  %v773_v47 = vrot.slane %v754_v35, 4 }
 0x1d8   : > { %v591_v48 = vsel %vm564_vm7, %v583_v13, %v590_v41  ;;  %v778_v49 = vperm.slane %v772_v43, %v1989_v19  ;;  %v786_v50 = vsel %vm564_vm7, %v770_v9, %v785_v39  ;;  %v790_v51 = vperm.slane %v784_v38, %v1989_v19 }
 0x1d9   : > { %v599_v53 = vperm.slane %v591_v48, %v1989_v19  ;;  %v612_v54 = vrot.slane %v595_v44, 4  ;;  %v618_v55 = vrot.slane %v611_v45, 4  ;;  %v617_v56 = vsel %vm564_vm7, 0.0, %v616_v46 }
 0x1da   : > { %v774_v57 = vsel %vm564_vm7, %v766_v14, %v773_v47  ;;  %v794_v58 = vperm.slane %v786_v50, %v1989_v19  ;;  %v795_v59 = vrot.slane %v778_v49, 4  ;;  %v799_v63 = vrot.slane %v790_v51, 4 }
 0x1db   : > { %v614_v60 = vrot.slane %v599_v53, 4  ;;  %v619_v61 = vsel %vm564_vm7, 0.0, %v618_v55  ;;  %v631_v62 = vsel %vm564_vm7, %v618_v55, %v607_v37  ;;  %v613_v0 = vsel %vm564_vm7, 0.0, %v612_v54  ;;  %v900_v37 = vpop.permute.xlu0 %899 }
 0x1dc   : > { %v635_v2 = vperm.slane %v631_v62, %v1972_v1  ;;  %v636_v3 = vrot.slane %v619_v61, 4  ;;  %v782_v4 = vperm.slane %v774_v57, %v1989_v19  ;;  %v796_v7 = vsel %vm564_vm7, 0.0, %v795_v59  ;;  %v906_v59 = vpop.permute.xlu1 %905 }
 0x1dd   : > { %v615_v5 = vsel %vm564_vm7, 0.0, %v614_v60  ;;  %v620_v6 = vsel %vm564_vm7, %v614_v60, %v595_v44  ;;  %v801_v8 = vrot.slane %v794_v58, 4  ;;  %v800_v15 = vsel %vm564_vm7, 0.0, %v799_v63 }
 0x1de   : > { %v624_v9 = vperm.slane %v620_v6, %v1972_v1  ;;  %v625_v10 = vrot.slane %v615_v5, 4  ;;  %v637_v11 = vsel %vm564_vm7, %v636_v3, %v617_v56  ;;  %v656_v12 = vrot.slane %v635_v2, 4 }
 0x1df   : > { %v641_v13 = vperm.slane %v637_v11, %v1972_v1  ;;  %v797_v14 = vrot.slane %v782_v4, 4  ;;  %v802_v16 = vsel %vm564_vm7, 0.0, %v801_v8  ;;  %v814_v22 = vsel %vm564_vm7, %v801_v8, %v790_v51 }
 0x1e0   : > { %v626_v20 = vsel %vm564_vm7, %v625_v10, %v613_v0  ;;  %v644_v21 = vrot.slane %v624_v9, 4  ;;  %v819_v23 = vrot.slane %v802_v16, 4  ;;  %v922_v50 = vrot.slane %v900_v37, 4 }
 0x1e1   : > { %v630_v24 = vperm.slane %v626_v20, %v1972_v1  ;;  %v654_v25 = vrot.slane %v641_v13, 4  ;;  %v657_v26 = vsel %vm564_vm7, %v641_v13, %v656_v12  ;;  %v798_v27 = vsel %vm564_vm7, 0.0, %v797_v14 }
 0x1e2   : > { %v665_v28 = vperm.slane %v657_v26, %v1989_v19  ;;  %v803_v29 = vsel %vm564_vm7, %v797_v14, %v778_v49  ;;  %v808_v30 = vrot.slane %v798_v27, 4  ;;  %v820_v31 = vsel %vm564_vm7, %v819_v23, %v800_v15 }
 0x1e3   : > { %v642_v32 = vrot.slane %v630_v24, 4  ;;  %v645_v33 = vsel %vm564_vm7, %v630_v24, %v644_v21  ;;  %v655_v34 = vsel %vm564_vm7, %v654_v25, %v635_v2  ;;  %v807_v35 = vperm.slane %v803_v29, %v1972_v1 }
 0x1e4   : > { %v653_v38 = vperm.slane %v645_v33, %v1989_v19  ;;  %v661_v39 = vperm.slane %v655_v34, %v1989_v19  ;;  %v670_v40 = vrot.slane %v665_v28, 4  ;;  %v809_v41 = vsel %vm564_vm7, %v808_v30, %v796_v7 }
 0x1e5   : > { %v643_v42 = vsel %vm564_vm7, %v642_v32, %v624_v9  ;;  %v813_v43 = vperm.slane %v809_v41, %v1972_v1  ;;  %v824_v44 = vperm.slane %v820_v31, %v1972_v1  ;;  %v827_v45 = vrot.slane %v807_v35, 4 }
 0x1e6   : > { %v649_v46 = vperm.slane %v643_v42, %v1989_v19  ;;  %v666_v47 = vrot.slane %v661_v39, 4  ;;  %v671_v48 = vsel %vm564_vm7, %v670_v40, %v653_v38  ;;  %v818_v49 = vperm.slane %v814_v22, %v1972_v1 }
 0x1e7   : > { %v825_v51 = vrot.slane %v813_v43, 4  ;;  %v828_v53 = vsel %vm564_vm7, %v813_v43, %v827_v45  ;;  %v837_v54 = vrot.slane %v824_v44, 4  ;;  %v672_v56 = vrot.slane %v653_v38, 4 }
 0x1e8   : > { %v668_v55 = vrot.slane %v649_v46, 4  ;;  %v667_v57 = vsel %vm564_vm7, %v666_v47, %v649_v46  ;;  %v836_v58 = vperm.slane %v828_v53, %v1989_v19  ;;  %v676_v61 = vpack.c.bf16 %v671_v48, %v671_v48 }
 0x1e9   : > { %v674_v60 = vpack.c.bf16 %v667_v57, %v667_v57  ;;  %v826_v62 = vsel %vm564_vm7, %v825_v51, %v807_v35  ;;  %v838_v63 = vsel %vm564_vm7, %v837_v54, %v818_v49  ;;  %v839_v3 = vrot.slane %v818_v49, 4 }
 0x1ea   : > { %v669_v0 = vsel %vm564_vm7, %v661_v39, %v668_v55  ;;  %v832_v2 = vperm.slane %v826_v62, %v1989_v19  ;;  %v844_v4 = vperm.slane %v838_v63, %v1989_v19  ;;  %v855_v6 = vrot.slane %v836_v58, 4  ;;  %681 = vst.msk [vmem:[%s2081_s2 + $0x8] sm:$0xf] %vm678_vm8, %v676_v61 }
 0x1eb   : > { %v675_v5 = vpack.c.bf16 %v669_v0, %v669_v0  ;;  %v920_v7 = vrot.slane %v906_v59, 4  ;;  %v923_v8 = vsel %vm564_vm7, %v906_v59, %v922_v50  ;;  %v840_v9 = vsel %vm564_vm7, %v824_v44, %v839_v3  ;;  %679 = vst.msk [vmem:[%s2081_s2] sm:$0xf] %vm678_vm8, %v674_v60 }
 0x1ec   : > { %v849_v10 = vrot.slane %v844_v4, 4  ;;  %v851_v11 = vrot.slane %v832_v2, 4  ;;  %v931_v12 = vperm.slane %v923_v8, %v1972_v1  ;;  %v2073_v13 = vsel %vm564_vm7, %v665_v28, %v672_v56 }
 0x1ed   : > { %v848_v14 = vperm.slane %v840_v9, %v1989_v19  ;;  %v921_v15 = vsel %vm564_vm7, %v920_v7, %v900_v37  ;;  %680 = vst.msk [vmem:[%s2081_s2 + $0x4] sm:$0xf] %vm678_vm8, %v675_v5 }
 0x1ee   : > { %v850_v16 = vsel %vm564_vm7, %v849_v10, %v832_v2  ;;  %v852_v20 = vsel %vm564_vm7, %v844_v4, %v851_v11  ;;  %v927_v21 = vperm.slane %v921_v15, %v1972_v1  ;;  %v944_v22 = vrot.slane %v931_v12, 4 }
 0x1ef   : > { %v853_v23 = vrot.slane %v848_v14, 4  ;;  %v856_v24 = vsel %vm564_vm7, %v848_v14, %v855_v6  ;;  %v857_v25 = vpack.c.bf16 %v850_v16, %v850_v16  ;;  %v858_v26 = vpack.c.bf16 %v852_v20, %v852_v20 }
 0x1f0   : > { %v860_v27 = vpack.c.bf16 %v856_v24, %v856_v24  ;;  %v932_v28 = vrot.slane %v927_v21, 4  ;;  %v935_v29 = vsel %vm564_vm7, %v927_v21, %v934_v52  ;;  %v945_v30 = vsel %vm564_vm7, %v944_v22, %v1987_v18 }
 0x1f1   : > { %v854_v31 = vsel %vm564_vm7, %v853_v23, %v836_v58  ;;  %v943_v32 = vperm.slane %v935_v29, %v1989_v19  ;;  %v947_v33 = vsel %vm564_vm7, %v931_v12, %v946_v36  ;;  %v951_v34 = vperm.slane %v945_v30, %v1989_v19  ;;  %861 = vst.msk [vmem:[%s485_s24] sm:$0xf] %vm678_vm8, %v857_v25 }
 0x1f2   : > { %v677_v52 = vpack.c.bf16 %v2073_v13, %v2073_v13  ;;  %v859_v35 = vpack.c.bf16 %v854_v31, %v854_v31  ;;  %v933_v37 = vsel %vm564_vm7, %v932_v28, %v1984_v17  ;;  %v955_v38 = vperm.slane %v947_v33, %v1989_v19  ;;  %862 = vst.msk [vmem:[%s485_s24 + $0x4] sm:$0xf] %vm678_vm8, %v858_v26 }
 0x1f3   : > { %v939_v18 = vperm.slane %v933_v37, %v1989_v19  ;;  %v958_v36 = vrot.slane %v943_v32, 4  ;;  %v960_v39 = vrot.slane %v951_v34, 4  ;;  %864 = vst.msk [vmem:[%s485_s24 + $0xc] sm:$0xf] %vm678_vm8, %v860_v27 }
 0x1f4   : > { %v962_v40 = vrot.slane %v955_v38, 4  ;;  %863 = vst.msk [vmem:[%s485_s24 + $0x8] sm:$0xf] %vm678_vm8, %v859_v35  ;;  %s1609_s24 = scalar_lea.hbm %s2256_s10, 32 }
 0x1f5   : > { %v956_v17 = vrot.slane %v939_v18, 4  ;;  %v959_v41 = vsel %vm564_vm7, 0.0, %v958_v36  ;;  %v961_v42 = vsel %vm564_vm7, 0.0, %v960_v39  ;;  %v964_v43 = vsel %vm564_vm7, %v958_v36, %v939_v18  ;;  %p1611_p11 = scmp.lt.s32.totalorder %s1609_s24, %s1605_s25 }
 0x1f7   : > { %p1612_p12 = por %p1611_p11, %p1610_p10 }
 0x1f9   : > { %p1613_p13 = pnand %p1612_p12, %p1608_p9 }
 0x1fb   : > { %1616 = shalt.err (!%p1613_p13)
}
 0x1fc   : > { %s1751_s23 = smov 64   ;;  %s2283_s26 = sld [smem:[#allocation22_spill]]  ;;  %v963_v44 = vsel %vm564_vm7, 0.0, %v962_v40  ;;  %v968_v45 = vperm.slane %v964_v43, %v1972_v1  ;;  %v969_v46 = vrot.slane %v959_v41, 4  ;;  %v975_v47 = vsel %vm564_vm7, %v962_v40, %v951_v34  ;;  %682 = vst.msk [vmem:[%s2081_s2 + $0xc] sm:$0xf] %vm678_vm8, %v677_v52 }
 0x1fd   : > { %s1752_s4 = smov 4   ;;  %v957_v48 = vsel %vm564_vm7, 0.0, %v956_v17  ;;  %v979_v49 = vperm.slane %v975_v47, %v1972_v1  ;;  %v980_v50 = vrot.slane %v963_v44, 4  ;;  %s1027_s0 = scalar_lea.sflag [#allocation4], %s1924_s15 }
 0x1fe   : > { %1348 = dma.vmem_to_hbm [thread:$0]  (%p1902_p4), %s2118_s3, 256, %s1071_s12, %s2132_s29, %s1751_s23, %s1751_s23, %s1752_s4  }
 0x1ff   : > { %s1637_s13 = scalar_lea.hbm %s2255_s9, 32 }
 0x202   : > { %s2284_s20 = int_to_ptr.hbm [resolvable:$true] %s2283_s26 }
 0x203   : > { %s1631_s1 = sshra.s32 %s2284_s20, 4  ;;  %s1632_s1 = int_to_ptr.hbm [resolvable:$true] %s1631_s1 }
 0x204   : > { %s1633_s25 = scalar_lea.hbm %s1632_s1, 16  ;;  %p1638_p8 = scmp.lt.s32.totalorder %s1632_s1, %s2255_s9 }
 0x205   : > { %p1634_p0 = scmp.ne.s32.totalorder %s1632_s1, %s1633_s25  ;;  %p1639_p1 = scmp.lt.s32.totalorder %s1637_s13, %s1633_s25 }
 0x207   : > { %p1635_p2 = pnand %p1634_p0, %p1902_p4  ;;  %p1640_p3 = por %p1639_p1, %p1638_p8 }
 0x209   : > { %p1636_p5 = pneg %p1635_p2 }
 0x20b   : > { %p1641_p9 = pnand %p1640_p3, %p1636_p5 }
 0x20d   : > { %1644 = shalt.err (!%p1641_p9)
}
 0x20e   : > { %s2285_s15 = smov %s2284_s20  ;;  %v970_v51 = vsel %vm564_vm7, %v969_v46, %v957_v48  ;;  %v988_v53 = vrot.slane %v968_v45, 4  ;;  %v981_v55 = vsel %vm564_vm7, %v980_v50, %v961_v42  ;;  %v1000_v56 = vrot.slane %v979_v49, 4  ;;  %s1085_s26 = scalar_lea.hbm %s2257_s11, %s2056_s17 }
 0x20f   : > { %1347 = dma.vmem_to_hbm [thread:$0]  (%p1902_p4), %s2124_s28, 256, %s2285_s15, %s1027_s0, %s1751_s23, %s1751_s23, %s1752_s4   ;;  %v974_v54 = vperm.slane %v970_v51, %v1972_v1  ;;  %v985_v57 = vperm.slane %v981_v55, %v1972_v1 }
 0x210   : > { %s2197_s0 = sshll.u32 %s1085_s26, 4  ;;  %s492_s20 = scalar_lea.vmem [#allocation13], %s2062_s27  ;;  %s1089_s0 = int_to_ptr.hbm [resolvable:$true] %s2197_s0 }
 0x211   : > { %v986_v58 = vrot.slane %v974_v54, 4  ;;  %v989_v59 = vsel %vm564_vm7, %v974_v54, %v988_v53  ;;  %v998_v61 = vrot.slane %v985_v57, 4  ;;  %v1001_v62 = vsel %vm564_vm7, %v985_v57, %v1000_v56  ;;  %s1086_s1 = sshll.u32 %s492_s20, 4  ;;  %s1659_s17 = sshra.s32 %s1089_s0, 4  ;;  %s1087_s1 = int_to_ptr.vmem [resolvable:$true] %s1086_s1  ;;  %s1660_s17 = int_to_ptr.hbm [resolvable:$true] %s1659_s17 }
 0x212   : > { %v997_v60 = vperm.slane %v989_v59, %v1989_v19  ;;  %v1009_v0 = vperm.slane %v1001_v62, %v1989_v19  ;;  %s1661_s27 = scalar_lea.hbm %s1660_s17, 16  ;;  %s1665_s12 = scalar_lea.hbm %s2257_s11, 32 }
 0x213   : > { %v987_v63 = vsel %vm564_vm7, %v986_v58, %v968_v45  ;;  %v999_v3 = vsel %vm564_vm7, %v998_v61, %v979_v49  ;;  %p1662_p10 = scmp.ne.s32.totalorder %s1660_s17, %s1661_s27  ;;  %p1666_p13 = scmp.lt.s32.totalorder %s1660_s17, %s2257_s11 }
 0x214   : > { %v993_v2 = vperm.slane %v987_v63, %v1989_v19  ;;  %v1016_v4 = vrot.slane %v997_v60, 4  ;;  %v1005_v1 = vperm.slane %v999_v3, %v1989_v19  ;;  %v1014_v5 = vrot.slane %v1009_v0, 4  ;;  %p1667_p0 = scmp.lt.s32.totalorder %s1665_s12, %s1661_s27 }
 0x215   : > { %p1663_p11 = pnand %p1662_p10, %p1902_p4 }
 0x216   : > { %v1012_v6 = vrot.slane %v993_v2, 4  ;;  %v1017_v7 = vsel %vm564_vm7, %v1009_v0, %v1016_v4  ;;  %v1010_v8 = vrot.slane %v1005_v1, 4  ;;  %v1015_v9 = vsel %vm564_vm7, %v1014_v5, %v997_v60  ;;  %p1668_p2 = por %p1667_p0, %p1666_p13 }
 0x217   : > { %v1021_v10 = vpack.c.bf16 %v1017_v7, %v1017_v7  ;;  %v1020_v12 = vpack.c.bf16 %v1015_v9, %v1015_v9  ;;  %p1664_p12 = pneg %p1663_p11 }
 0x218   : > { %v1013_v11 = vsel %vm564_vm7, %v1005_v1, %v1012_v6  ;;  %v1011_v13 = vsel %vm564_vm7, %v1010_v8, %v993_v2 }
 0x219   : > { %v1019_v19 = vpack.c.bf16 %v1013_v11, %v1013_v11  ;;  %1025 = vst.msk [vmem:[%s492_s20 + $0xc] sm:$0xf] %vm678_vm8, %v1021_v10  ;;  %v1018_v14 = vpack.c.bf16 %v1011_v13, %v1011_v13  ;;  %p1669_p5 = pnand %p1668_p2, %p1664_p12 }
 0x21a   : > { %1024 = vst.msk [vmem:[%s492_s20 + $0x8] sm:$0xf] %vm678_vm8, %v1020_v12 }
 0x21b   : > { %1023 = vst.msk [vmem:[%s492_s20 + $0x4] sm:$0xf] %vm678_vm8, %v1019_v19 }
 0x21c   : > { %1022 = vst.msk [vmem:[%s492_s20] sm:$0xf] %vm678_vm8, %v1018_v14 }
 0x21d   : > { %1672 = shalt.err (!%p1669_p5)
}
 0x21e   : > { %1349 = dma.vmem_to_hbm [thread:$0]  (%p1902_p4), %s1087_s1, 256, %s1089_s0, %s2132_s29, %s1751_s23, %s1751_s23, %s1752_s4  }
 0x21f PF: > { %s2286_s2 = sld [smem:[#allocation19_spill]]  ;;  %p1368_p8 = pnand %p1275_p6, %p1910_p7 }
 0x221   : > { %p1369_p1 = pneg %p1368_p8 }
 0x225   : > { %s1103_s15 = sand.u32 1, %s2286_s2  }
 0x226   : > { %s1104_s28 = scalar_lea.sflag [#allocation4], %s1103_s15 }
 0x227   : > { %1710 = dma.done.wait (%p1369_p1), %s1104_s28, 256  }
 0x228   : > { %1712 = vsyncadd (%p1369_p1), %s1104_s28, 4294967040  ;;  %s2287_s24 = sadd.s32 4294967294, %s1739_s22  }
 0x229   : > { %s1113_s14 = sand.u32 1, %s2287_s24  }
 0x22a   : > { %s1114_s26 = scalar_lea.sflag [#allocation12], %s1113_s14 }
 0x22b   : > { %1714 = dma.done.wait (%p1369_p1), %s1114_s26, 512  }
 0x22c   : > { %1716 = vsyncadd (%p1369_p1), %s1114_s26, 4294966784  ;;  %s33_s22 = sadd.s32 1, %s1739_s22   ;;  %s2288_s4 = sld [smem:[#allocation21_spill]] }
 0x22d   : > { %p30_p4 = scmp.ge.s32.totalorder %s33_s22, 4   ;;  %s2289_s16 = sld [smem:[#allocation20_spill]] }
 0x22e   : > { %s2290_s17 = smov %s1723_s18  ;;  %s2291_s18 = smov %s1727_s19 }
 0x22f   : > { %s2293_s20 = smov %s1735_s21  ;;  %32 = sbr.rel (!%p30_p4) target bundleno = 16 (0x10), region = 145 }
 0x232   : > { %s2292_s19 = smov %s2288_s4 }
 0x233   : > { %s2294_s21 = smov %s2289_s16 }
 0x234   :  { %1130 = vsyncpa [#allocation3], 1 }
 0x235   :  { %1132 = vsyncpa [#allocation3 + $0x1], 1 }
 0x236   :  { %1133 = vsyncpa [#allocation6], 1 }
 0x237   :  { %1134 = vsyncpa [#allocation9], 1 }
 0x238   :  { %1135 = vsyncpa [#allocation4], 1 }
 0x239   :  { %1137 = vsyncpa [#allocation4 + $0x1], 1 }
 0x23a   :  { %1138 = vsyncpa [#allocation12], 1 }
 0x23b   :  { %1140 = vsyncpa [#allocation12 + $0x1], 1 }

</bundles_post_ra>
